<compile_context>
chip_gen: v5e
topology: v5e:2x2
jax: 0.10.0
libtpu: 0.0.40
codegen_flags: <defaults>
</compile_context>

<pallas_src>
import functools
import math

import jax
import jax.numpy as jnp
from jax import lax
from jax.experimental import pallas as pl
from jax.experimental.pallas import tpu as pltpu

D_MODEL = 32
VOCAB = 64


# --------------------------------- kernel ----------------------------------
def _embedding_gather_kernel(ids_ref, lut_ref, out_ref, *, scale, block_tokens):
    """Row-gather + scale.  ids_ref lives in SMEM (scalar prefetch)."""
    vocab = lut_ref.shape[0]
    base = pl.program_id(0) * block_tokens

    def copy_row(t, carry):
        # Clamp to match the reference (lut[ids]) semantics for invalid ids.
        idx = jnp.clip(ids_ref[base + t], 0, vocab - 1)
        row = lut_ref[pl.ds(idx, 1), :]                 # (1, D) dynamic sublane slice
        out_ref[pl.ds(t, 1), :] = row * scale           # fused sqrt(d_model) scale
        return carry

    # Unroll short fixed loops for LLO scheduler visibility; bounded unroll
    # for large token blocks to keep compile time sane.
    unroll = True if block_tokens <= 32 else 8
    lax.fori_loop(0, block_tokens, copy_row, 0, unroll=unroll)


# -------------------------------- wrapper -----------------------------------
def scaled_embedding(ids, lut, *, num_token_blocks=1):
    """Computes lut[ids] * sqrt(d_model)  (Embeddings.forward).

    num_token_blocks > 1 exposes a 'parallel' token axis (use 2 on v7x to
    shard across its two TensorCores at real token counts); 1 is best on
    single-TC v5e/v6e and at toy sizes.
    """
    B, T = ids.shape
    V, D = lut.shape
    N = B * T
    assert N % num_token_blocks == 0
    TB = N // num_token_blocks
    # (8, 128) tiling: the (TB, D) output block needs TB % 8 == 0 unless the
    # block spans the full token axis.
    assert num_token_blocks == 1 or TB % 8 == 0, (
        "token block size must be a multiple of 8 (sublane tiling)")

    ids_flat = ids.reshape(N).astype(jnp.int32)
    scale = math.sqrt(D)
    kernel = functools.partial(
        _embedding_gather_kernel, scale=scale, block_tokens=TB)

    # VMEM budget: resident table (double-buffered by default) + output block
    # double-buffer + slack.  Raise above the scoped default only when needed.
    itemsize = jnp.dtype(lut.dtype).itemsize
    needed = 2 * V * D * itemsize + 2 * TB * D * itemsize + (1 << 20)
    vmem_limit = int(min(max(needed, 32 << 20), 48 << 20))

    grid_spec = pltpu.PrefetchScalarGridSpec(
        num_scalar_prefetch=1,                              # ids -> SMEM
        grid=(num_token_blocks,),
        in_specs=[
            # Full table, constant index_map -> resident in VMEM across steps.
            pl.BlockSpec((V, D), lambda i, ids_ref: (0, 0)),
        ],
        out_specs=pl.BlockSpec((TB, D), lambda i, ids_ref: (i, 0)),
    )
    out = pl.pallas_call(
        kernel,
        out_shape=jax.ShapeDtypeStruct((N, D), lut.dtype),
        grid_spec=grid_spec,
        compiler_params=pltpu.CompilerParams(
            dimension_semantics=("parallel",),
            vmem_limit_bytes=vmem_limit,
        ),
    )(ids_flat, lut)
    return out.reshape(B, T, D)


# ------------------------- pure-JAX reference -------------------------------
def reference(ids, lut):
    return lut[ids] * math.sqrt(lut.shape[1])


# ----------------------------------- main ------------------------------------
if __name__ == "__main__":
    B, T = 2, 8
    key = jax.random.PRNGKey(0)
    k_ids, k_lut = jax.random.split(key)

    ids = jax.random.randint(k_ids, (B, T), 0, VOCAB, dtype=jnp.int32)
    lut = jax.random.normal(k_lut, (VOCAB, D_MODEL), jnp.float32)

    out = scaled_embedding(ids, lut)
    out = jax.block_until_ready(out)

    ref = reference(ids, lut)
    assert out.shape == (B, T, D_MODEL)
    assert jnp.allclose(out, ref, atol=1e-6, rtol=1e-6), float(
        jnp.max(jnp.abs(out - ref)))
    print("KERNEL_OK")
</pallas_src>

<mosaic_0001>
module attributes {stable_mosaic.version = 11 : i64} {
  func.func @_embedding_gather_kernel(%arg0: i32, %arg1: memref<16xi32, #tpu.memory_space<smem>>, %arg2: memref<64x32xf32, #tpu.memory_space<vmem>>, %arg3: memref<16x32xf32, #tpu.memory_space<vmem>>) attributes {dimension_semantics = [#tpu.dimension_semantics<parallel>], iteration_bounds = array<i64: 1>, scalar_prefetch = 1 : i64, scratch_operands = 0 : i64, tpu.core_type = #tpu.core_type<tc>, window_params = [{pipeline_mode = #tpu.pipeline_mode<synchronous>, transform_indices = @transform_0, window_bounds = array<i64: 64, 32>}, {transform_indices = @transform_1, window_bounds = array<i64: 16, 32>}]} {
    %c16_i32 = arith.constant 16 : i32
    %0 = arith.muli %arg0, %c16_i32 : i32
    %c0_i32 = arith.constant 0 : i32
    %1 = arith.addi %0, %c0_i32 : i32
    %2 = arith.index_cast %1 : i32 to index
    %3 = memref.load %arg1[%2] : memref<16xi32, #tpu.memory_space<smem>>
    %c0_i32_0 = arith.constant 0 : i32
    %c63_i32 = arith.constant 63 : i32
    %4 = arith.maxsi %c0_i32_0, %3 : i32
    %5 = arith.minsi %c63_i32, %4 : i32
    %6 = arith.index_cast %5 : i32 to index
    %c0 = arith.constant 0 : index
    %7 = vector.load %arg2[%6, %c0] : memref<64x32xf32, #tpu.memory_space<vmem>>, vector<1x32xf32>
    %cst = arith.constant 5.65685415 : f32
    %8 = vector.broadcast %cst : f32 to vector<1x32xf32>
    %9 = arith.mulf %7, %8 : vector<1x32xf32>
    %10 = arith.index_cast %c0_i32 : i32 to index
    %c0_1 = arith.constant 0 : index
    %11 = vector.load %arg3[%10, %c0_1] : memref<16x32xf32, #tpu.memory_space<vmem>>, vector<1x32xf32>
    tpu.vector_store %arg3[%10, %c0_1], %9 {strides = array<i32>} : memref<16x32xf32, #tpu.memory_space<vmem>>, vector<1x32xf32>,
    %c1_i32 = arith.constant 1 : i32
    %12 = arith.addi %0, %c1_i32 : i32
    %13 = arith.index_cast %12 : i32 to index
    %14 = memref.load %arg1[%13] : memref<16xi32, #tpu.memory_space<smem>>
    %c0_i32_2 = arith.constant 0 : i32
    %c63_i32_3 = arith.constant 63 : i32
    %15 = arith.maxsi %c0_i32_2, %14 : i32
    %16 = arith.minsi %c63_i32_3, %15 : i32
    %17 = arith.index_cast %16 : i32 to index
    %c0_4 = arith.constant 0 : index
    %18 = vector.load %arg2[%17, %c0_4] : memref<64x32xf32, #tpu.memory_space<vmem>>, vector<1x32xf32>
    %cst_5 = arith.constant 5.65685415 : f32
    %19 = vector.broadcast %cst_5 : f32 to vector<1x32xf32>
    %20 = arith.mulf %18, %19 : vector<1x32xf32>
    %21 = arith.index_cast %c1_i32 : i32 to index
    %c0_6 = arith.constant 0 : index
    %22 = vector.load %arg3[%21, %c0_6] : memref<16x32xf32, #tpu.memory_space<vmem>>, vector<1x32xf32>
    tpu.vector_store %arg3[%21, %c0_6], %20 {strides = array<i32>} : memref<16x32xf32, #tpu.memory_space<vmem>>, vector<1x32xf32>,
    %c2_i32 = arith.constant 2 : i32
    %23 = arith.addi %0, %c2_i32 : i32
    %24 = arith.index_cast %23 : i32 to index
    %25 = memref.load %arg1[%24] : memref<16xi32, #tpu.memory_space<smem>>
    %c0_i32_7 = arith.constant 0 : i32
    %c63_i32_8 = arith.constant 63 : i32
    %26 = arith.maxsi %c0_i32_7, %25 : i32
    %27 = arith.minsi %c63_i32_8, %26 : i32
    %28 = arith.index_cast %27 : i32 to index
    %c0_9 = arith.constant 0 : index
    %29 = vector.load %arg2[%28, %c0_9] : memref<64x32xf32, #tpu.memory_space<vmem>>, vector<1x32xf32>
    %cst_10 = arith.constant 5.65685415 : f32
    %30 = vector.broadcast %cst_10 : f32 to vector<1x32xf32>
    %31 = arith.mulf %29, %30 : vector<1x32xf32>
    %32 = arith.index_cast %c2_i32 : i32 to index
    %c0_11 = arith.constant 0 : index
    %33 = vector.load %arg3[%32, %c0_11] : memref<16x32xf32, #tpu.memory_space<vmem>>, vector<1x32xf32>
    tpu.vector_store %arg3[%32, %c0_11], %31 {strides = array<i32>} : memref<16x32xf32, #tpu.memory_space<vmem>>, vector<1x32xf32>,
    %c3_i32 = arith.constant 3 : i32
    %34 = arith.addi %0, %c3_i32 : i32
    %35 = arith.index_cast %34 : i32 to index
    %36 = memref.load %arg1[%35] : memref<16xi32, #tpu.memory_space<smem>>
    %c0_i32_12 = arith.constant 0 : i32
    %c63_i32_13 = arith.constant 63 : i32
    %37 = arith.maxsi %c0_i32_12, %36 : i32
    %38 = arith.minsi %c63_i32_13, %37 : i32
    %39 = arith.index_cast %38 : i32 to index
    %c0_14 = arith.constant 0 : index
    %40 = vector.load %arg2[%39, %c0_14] : memref<64x32xf32, #tpu.memory_space<vmem>>, vector<1x32xf32>
    %cst_15 = arith.constant 5.65685415 : f32
    %41 = vector.broadcast %cst_15 : f32 to vector<1x32xf32>
    %42 = arith.mulf %40, %41 : vector<1x32xf32>
    %43 = arith.index_cast %c3_i32 : i32 to index
    %c0_16 = arith.constant 0 : index
    %44 = vector.load %arg3[%43, %c0_16] : memref<16x32xf32, #tpu.memory_space<vmem>>, vector<1x32xf32>
    tpu.vector_store %arg3[%43, %c0_16], %42 {strides = array<i32>} : memref<16x32xf32, #tpu.memory_space<vmem>>, vector<1x32xf32>,
    %c4_i32 = arith.constant 4 : i32
    %45 = arith.addi %0, %c4_i32 : i32
    %46 = arith.index_cast %45 : i32 to index
    %47 = memref.load %arg1[%46] : memref<16xi32, #tpu.memory_space<smem>>
    %c0_i32_17 = arith.constant 0 : i32
    %c63_i32_18 = arith.constant 63 : i32
    %48 = arith.maxsi %c0_i32_17, %47 : i32
    %49 = arith.minsi %c63_i32_18, %48 : i32
    %50 = arith.index_cast %49 : i32 to index
    %c0_19 = arith.constant 0 : index
    %51 = vector.load %arg2[%50, %c0_19] : memref<64x32xf32, #tpu.memory_space<vmem>>, vector<1x32xf32>
    %cst_20 = arith.constant 5.65685415 : f32
    %52 = vector.broadcast %cst_20 : f32 to vector<1x32xf32>
    %53 = arith.mulf %51, %52 : vector<1x32xf32>
    %54 = arith.index_cast %c4_i32 : i32 to index
    %c0_21 = arith.constant 0 : index
    %55 = vector.load %arg3[%54, %c0_21] : memref<16x32xf32, #tpu.memory_space<vmem>>, vector<1x32xf32>
    tpu.vector_store %arg3[%54, %c0_21], %53 {strides = array<i32>} : memref<16x32xf32, #tpu.memory_space<vmem>>, vector<1x32xf32>,
    %c5_i32 = arith.constant 5 : i32
    %56 = arith.addi %0, %c5_i32 : i32
    %57 = arith.index_cast %56 : i32 to index
    %58 = memref.load %arg1[%57] : memref<16xi32, #tpu.memory_space<smem>>
    %c0_i32_22 = arith.constant 0 : i32
    %c63_i32_23 = arith.constant 63 : i32
    %59 = arith.maxsi %c0_i32_22, %58 : i32
    %60 = arith.minsi %c63_i32_23, %59 : i32
    %61 = arith.index_cast %60 : i32 to index
    %c0_24 = arith.constant 0 : index
    %62 = vector.load %arg2[%61, %c0_24] : memref<64x32xf32, #tpu.memory_space<vmem>>, vector<1x32xf32>
    %cst_25 = arith.constant 5.65685415 : f32
    %63 = vector.broadcast %cst_25 : f32 to vector<1x32xf32>
    %64 = arith.mulf %62, %63 : vector<1x32xf32>
    %65 = arith.index_cast %c5_i32 : i32 to index
    %c0_26 = arith.constant 0 : index
    %66 = vector.load %arg3[%65, %c0_26] : memref<16x32xf32, #tpu.memory_space<vmem>>, vector<1x32xf32>
    tpu.vector_store %arg3[%65, %c0_26], %64 {strides = array<i32>} : memref<16x32xf32, #tpu.memory_space<vmem>>, vector<1x32xf32>,
    %c6_i32 = arith.constant 6 : i32
    %67 = arith.addi %0, %c6_i32 : i32
    %68 = arith.index_cast %67 : i32 to index
    %69 = memref.load %arg1[%68] : memref<16xi32, #tpu.memory_space<smem>>
    %c0_i32_27 = arith.constant 0 : i32
    %c63_i32_28 = arith.constant 63 : i32
    %70 = arith.maxsi %c0_i32_27, %69 : i32
    %71 = arith.minsi %c63_i32_28, %70 : i32
    %72 = arith.index_cast %71 : i32 to index
    %c0_29 = arith.constant 0 : index
    %73 = vector.load %arg2[%72, %c0_29] : memref<64x32xf32, #tpu.memory_space<vmem>>, vector<1x32xf32>
    %cst_30 = arith.constant 5.65685415 : f32
    %74 = vector.broadcast %cst_30 : f32 to vector<1x32xf32>
    %75 = arith.mulf %73, %74 : vector<1x32xf32>
    %76 = arith.index_cast %c6_i32 : i32 to index
    %c0_31 = arith.constant 0 : index
    %77 = vector.load %arg3[%76, %c0_31] : memref<16x32xf32, #tpu.memory_space<vmem>>, vector<1x32xf32>
    tpu.vector_store %arg3[%76, %c0_31], %75 {strides = array<i32>} : memref<16x32xf32, #tpu.memory_space<vmem>>, vector<1x32xf32>,
    %c7_i32 = arith.constant 7 : i32
    %78 = arith.addi %0, %c7_i32 : i32
    %79 = arith.index_cast %78 : i32 to index
    %80 = memref.load %arg1[%79] : memref<16xi32, #tpu.memory_space<smem>>
    %c0_i32_32 = arith.constant 0 : i32
    %c63_i32_33 = arith.constant 63 : i32
    %81 = arith.maxsi %c0_i32_32, %80 : i32
    %82 = arith.minsi %c63_i32_33, %81 : i32
    %83 = arith.index_cast %82 : i32 to index
    %c0_34 = arith.constant 0 : index
    %84 = vector.load %arg2[%83, %c0_34] : memref<64x32xf32, #tpu.memory_space<vmem>>, vector<1x32xf32>
    %cst_35 = arith.constant 5.65685415 : f32
    %85 = vector.broadcast %cst_35 : f32 to vector<1x32xf32>
    %86 = arith.mulf %84, %85 : vector<1x32xf32>
    %87 = arith.index_cast %c7_i32 : i32 to index
    %c0_36 = arith.constant 0 : index
    %88 = vector.load %arg3[%87, %c0_36] : memref<16x32xf32, #tpu.memory_space<vmem>>, vector<1x32xf32>
    tpu.vector_store %arg3[%87, %c0_36], %86 {strides = array<i32>} : memref<16x32xf32, #tpu.memory_space<vmem>>, vector<1x32xf32>,
    %c8_i32 = arith.constant 8 : i32
    %89 = arith.addi %0, %c8_i32 : i32
    %90 = arith.index_cast %89 : i32 to index
    %91 = memref.load %arg1[%90] : memref<16xi32, #tpu.memory_space<smem>>
    %c0_i32_37 = arith.constant 0 : i32
    %c63_i32_38 = arith.constant 63 : i32
    %92 = arith.maxsi %c0_i32_37, %91 : i32
    %93 = arith.minsi %c63_i32_38, %92 : i32
    %94 = arith.index_cast %93 : i32 to index
    %c0_39 = arith.constant 0 : index
    %95 = vector.load %arg2[%94, %c0_39] : memref<64x32xf32, #tpu.memory_space<vmem>>, vector<1x32xf32>
    %cst_40 = arith.constant 5.65685415 : f32
    %96 = vector.broadcast %cst_40 : f32 to vector<1x32xf32>
    %97 = arith.mulf %95, %96 : vector<1x32xf32>
    %98 = arith.index_cast %c8_i32 : i32 to index
    %c0_41 = arith.constant 0 : index
    %99 = vector.load %arg3[%98, %c0_41] : memref<16x32xf32, #tpu.memory_space<vmem>>, vector<1x32xf32>
    tpu.vector_store %arg3[%98, %c0_41], %97 {strides = array<i32>} : memref<16x32xf32, #tpu.memory_space<vmem>>, vector<1x32xf32>,
    %c9_i32 = arith.constant 9 : i32
    %100 = arith.addi %0, %c9_i32 : i32
    %101 = arith.index_cast %100 : i32 to index
    %102 = memref.load %arg1[%101] : memref<16xi32, #tpu.memory_space<smem>>
    %c0_i32_42 = arith.constant 0 : i32
    %c63_i32_43 = arith.constant 63 : i32
    %103 = arith.maxsi %c0_i32_42, %102 : i32
    %104 = arith.minsi %c63_i32_43, %103 : i32
    %105 = arith.index_cast %104 : i32 to index
    %c0_44 = arith.constant 0 : index
    %106 = vector.load %arg2[%105, %c0_44] : memref<64x32xf32, #tpu.memory_space<vmem>>, vector<1x32xf32>
    %cst_45 = arith.constant 5.65685415 : f32
    %107 = vector.broadcast %cst_45 : f32 to vector<1x32xf32>
    %108 = arith.mulf %106, %107 : vector<1x32xf32>
    %109 = arith.index_cast %c9_i32 : i32 to index
    %c0_46 = arith.constant 0 : index
    %110 = vector.load %arg3[%109, %c0_46] : memref<16x32xf32, #tpu.memory_space<vmem>>, vector<1x32xf32>
    tpu.vector_store %arg3[%109, %c0_46], %108 {strides = array<i32>} : memref<16x32xf32, #tpu.memory_space<vmem>>, vector<1x32xf32>,
    %c10_i32 = arith.constant 10 : i32
    %111 = arith.addi %0, %c10_i32 : i32
    %112 = arith.index_cast %111 : i32 to index
    %113 = memref.load %arg1[%112] : memref<16xi32, #tpu.memory_space<smem>>
    %c0_i32_47 = arith.constant 0 : i32
    %c63_i32_48 = arith.constant 63 : i32
    %114 = arith.maxsi %c0_i32_47, %113 : i32
    %115 = arith.minsi %c63_i32_48, %114 : i32
    %116 = arith.index_cast %115 : i32 to index
    %c0_49 = arith.constant 0 : index
    %117 = vector.load %arg2[%116, %c0_49] : memref<64x32xf32, #tpu.memory_space<vmem>>, vector<1x32xf32>
    %cst_50 = arith.constant 5.65685415 : f32
    %118 = vector.broadcast %cst_50 : f32 to vector<1x32xf32>
    %119 = arith.mulf %117, %118 : vector<1x32xf32>
    %120 = arith.index_cast %c10_i32 : i32 to index
    %c0_51 = arith.constant 0 : index
    %121 = vector.load %arg3[%120, %c0_51] : memref<16x32xf32, #tpu.memory_space<vmem>>, vector<1x32xf32>
    tpu.vector_store %arg3[%120, %c0_51], %119 {strides = array<i32>} : memref<16x32xf32, #tpu.memory_space<vmem>>, vector<1x32xf32>,
    %c11_i32 = arith.constant 11 : i32
    %122 = arith.addi %0, %c11_i32 : i32
    %123 = arith.index_cast %122 : i32 to index
    %124 = memref.load %arg1[%123] : memref<16xi32, #tpu.memory_space<smem>>
    %c0_i32_52 = arith.constant 0 : i32
    %c63_i32_53 = arith.constant 63 : i32
    %125 = arith.maxsi %c0_i32_52, %124 : i32
    %126 = arith.minsi %c63_i32_53, %125 : i32
    %127 = arith.index_cast %126 : i32 to index
    %c0_54 = arith.constant 0 : index
    %128 = vector.load %arg2[%127, %c0_54] : memref<64x32xf32, #tpu.memory_space<vmem>>, vector<1x32xf32>
    %cst_55 = arith.constant 5.65685415 : f32
    %129 = vector.broadcast %cst_55 : f32 to vector<1x32xf32>
    %130 = arith.mulf %128, %129 : vector<1x32xf32>
    %131 = arith.index_cast %c11_i32 : i32 to index
    %c0_56 = arith.constant 0 : index
    %132 = vector.load %arg3[%131, %c0_56] : memref<16x32xf32, #tpu.memory_space<vmem>>, vector<1x32xf32>
    tpu.vector_store %arg3[%131, %c0_56], %130 {strides = array<i32>} : memref<16x32xf32, #tpu.memory_space<vmem>>, vector<1x32xf32>,
    %c12_i32 = arith.constant 12 : i32
    %133 = arith.addi %0, %c12_i32 : i32
    %134 = arith.index_cast %133 : i32 to index
    %135 = memref.load %arg1[%134] : memref<16xi32, #tpu.memory_space<smem>>
    %c0_i32_57 = arith.constant 0 : i32
    %c63_i32_58 = arith.constant 63 : i32
    %136 = arith.maxsi %c0_i32_57, %135 : i32
    %137 = arith.minsi %c63_i32_58, %136 : i32
    %138 = arith.index_cast %137 : i32 to index
    %c0_59 = arith.constant 0 : index
    %139 = vector.load %arg2[%138, %c0_59] : memref<64x32xf32, #tpu.memory_space<vmem>>, vector<1x32xf32>
    %cst_60 = arith.constant 5.65685415 : f32
    %140 = vector.broadcast %cst_60 : f32 to vector<1x32xf32>
    %141 = arith.mulf %139, %140 : vector<1x32xf32>
    %142 = arith.index_cast %c12_i32 : i32 to index
    %c0_61 = arith.constant 0 : index
    %143 = vector.load %arg3[%142, %c0_61] : memref<16x32xf32, #tpu.memory_space<vmem>>, vector<1x32xf32>
    tpu.vector_store %arg3[%142, %c0_61], %141 {strides = array<i32>} : memref<16x32xf32, #tpu.memory_space<vmem>>, vector<1x32xf32>,
    %c13_i32 = arith.constant 13 : i32
    %144 = arith.addi %0, %c13_i32 : i32
    %145 = arith.index_cast %144 : i32 to index
    %146 = memref.load %arg1[%145] : memref<16xi32, #tpu.memory_space<smem>>
    %c0_i32_62 = arith.constant 0 : i32
    %c63_i32_63 = arith.constant 63 : i32
    %147 = arith.maxsi %c0_i32_62, %146 : i32
    %148 = arith.minsi %c63_i32_63, %147 : i32
    %149 = arith.index_cast %148 : i32 to index
    %c0_64 = arith.constant 0 : index
    %150 = vector.load %arg2[%149, %c0_64] : memref<64x32xf32, #tpu.memory_space<vmem>>, vector<1x32xf32>
    %cst_65 = arith.constant 5.65685415 : f32
    %151 = vector.broadcast %cst_65 : f32 to vector<1x32xf32>
    %152 = arith.mulf %150, %151 : vector<1x32xf32>
    %153 = arith.index_cast %c13_i32 : i32 to index
    %c0_66 = arith.constant 0 : index
    %154 = vector.load %arg3[%153, %c0_66] : memref<16x32xf32, #tpu.memory_space<vmem>>, vector<1x32xf32>
    tpu.vector_store %arg3[%153, %c0_66], %152 {strides = array<i32>} : memref<16x32xf32, #tpu.memory_space<vmem>>, vector<1x32xf32>,
    %c14_i32 = arith.constant 14 : i32
    %155 = arith.addi %0, %c14_i32 : i32
    %156 = arith.index_cast %155 : i32 to index
    %157 = memref.load %arg1[%156] : memref<16xi32, #tpu.memory_space<smem>>
    %c0_i32_67 = arith.constant 0 : i32
    %c63_i32_68 = arith.constant 63 : i32
    %158 = arith.maxsi %c0_i32_67, %157 : i32
    %159 = arith.minsi %c63_i32_68, %158 : i32
    %160 = arith.index_cast %159 : i32 to index
    %c0_69 = arith.constant 0 : index
    %161 = vector.load %arg2[%160, %c0_69] : memref<64x32xf32, #tpu.memory_space<vmem>>, vector<1x32xf32>
    %cst_70 = arith.constant 5.65685415 : f32
    %162 = vector.broadcast %cst_70 : f32 to vector<1x32xf32>
    %163 = arith.mulf %161, %162 : vector<1x32xf32>
    %164 = arith.index_cast %c14_i32 : i32 to index
    %c0_71 = arith.constant 0 : index
    %165 = vector.load %arg3[%164, %c0_71] : memref<16x32xf32, #tpu.memory_space<vmem>>, vector<1x32xf32>
    tpu.vector_store %arg3[%164, %c0_71], %163 {strides = array<i32>} : memref<16x32xf32, #tpu.memory_space<vmem>>, vector<1x32xf32>,
    %c15_i32 = arith.constant 15 : i32
    %166 = arith.addi %0, %c15_i32 : i32
    %167 = arith.index_cast %166 : i32 to index
    %168 = memref.load %arg1[%167] : memref<16xi32, #tpu.memory_space<smem>>
    %c0_i32_72 = arith.constant 0 : i32
    %c63_i32_73 = arith.constant 63 : i32
    %169 = arith.maxsi %c0_i32_72, %168 : i32
    %170 = arith.minsi %c63_i32_73, %169 : i32
    %171 = arith.index_cast %170 : i32 to index
    %c0_74 = arith.constant 0 : index
    %172 = vector.load %arg2[%171, %c0_74] : memref<64x32xf32, #tpu.memory_space<vmem>>, vector<1x32xf32>
    %cst_75 = arith.constant 5.65685415 : f32
    %173 = vector.broadcast %cst_75 : f32 to vector<1x32xf32>
    %174 = arith.mulf %172, %173 : vector<1x32xf32>
    %175 = arith.index_cast %c15_i32 : i32 to index
    %c0_76 = arith.constant 0 : index
    %176 = vector.load %arg3[%175, %c0_76] : memref<16x32xf32, #tpu.memory_space<vmem>>, vector<1x32xf32>
    tpu.vector_store %arg3[%175, %c0_76], %174 {strides = array<i32>} : memref<16x32xf32, #tpu.memory_space<vmem>>, vector<1x32xf32>,
    %c16_i32_77 = arith.constant 16 : i32
    return
  }
  func.func @transform_0(%arg0: i32, %arg1: memref<16xi32, #tpu.memory_space<smem>>) -> (i32, i32) {
    %c0_i32 = arith.constant 0 : i32
    %c0_i32_0 = arith.constant 0 : i32
    %c0_i32_1 = arith.constant 0 : i32
    return %c0_i32, %c0_i32_0 : i32, i32
  }
  func.func @transform_1(%arg0: i32, %arg1: memref<16xi32, #tpu.memory_space<smem>>) -> (i32, i32) {
    %c0_i32 = arith.constant 0 : i32
    %c0_i32_0 = arith.constant 0 : i32
    return %arg0, %c0_i32 : i32, i32
  }
}

</mosaic_0001>

<bundles_post_ra>
// kernel: tpu_custom_call.1
= control target key start
LH: loop header
LB: loop body
LE: loop exit
PB: predicated region body
PF: predicated region fallthrough
CT: control target
= control target key end

     0   :  { %s384_s12 = smov [#allocation3]   ;;  %s506_s0 = inlined_call_operand.vmem [shape: s32[16], index: 0, kind: input, shape index: {}]   ;;  %s507_s1 = inlined_call_operand.vmem [shape: f32[64,32], index: 1, kind: input, shape index: {}]   ;;  %s508_s2 = inlined_call_operand.hbm [shape: f32[16,32], index: 2, kind: output, shape index: {}]  }
   0x1   :  { %s8_s11 = sshll.u32 %s506_s0, 4  ;;  %s9_s11 = int_to_ptr.vmem [resolvable:$true] %s8_s11 }
   0x2   :  { %11 = dma.vmem_to_smem %s9_s11, 16, %s384_s12, [#allocation2] }
   0x3   :  { %380 = dma.done.wait [#allocation2], 16 }
   0x4   :  { %381 = vsyncadd [#allocation2], 4294967280 }
   0x5   :  { %14 = sfence }
   0x6   :  { %s19_s13 = sld [smem:[#allocation3]] }
   0x7   :  { %15 = vsyncpa [#allocation5], 0  ;;  %s218_s14 = sld [smem:[#allocation3 + $0x1]]  ;;  %vm27_vm0 = vcmask 253952   ;;  %s387_s28 = smov 8  }
   0x8   :  { %s224_s15 = sld [smem:[#allocation3 + $0x2]] }
   0x9   :  { %s406_s16 = sld [smem:[#allocation3 + $0x3]] }
   0xa   :  { %s408_s17 = sld [smem:[#allocation3 + $0x4]] }
   0xb   :  { %s410_s18 = sld [smem:[#allocation3 + $0x5]] }
   0xc   :  { %p20_p0 = scmp.gt.s32.totalorder %s19_s13, 0  ;;  %p213_p1 = scmp.lt.s32.totalorder %s19_s13, 63 }
   0xd   :  { %p31_p2 = scmp.gt.s32.totalorder %s218_s14, 0  ;;  %p219_p3 = scmp.lt.s32.totalorder %s218_s14, 63 }
   0xe   :  { %s510_s13 = smov (!%p20_p0, %s19_s13), 0  ;;  %p41_p4 = scmp.gt.s32.totalorder %s224_s15, 0 }
   0xf   :  { %s512_s14 = smov (!%p31_p2, %s218_s14), 0  ;;  %s514_s13 = smov (!%p213_p1, %s510_s13), 63 }
  0x10   :  { %s516_s14 = smov (!%p219_p3, %s512_s14), 63  ;;  %s24_s20 = scalar_lea.vmem %s507_s1, %s514_s13 }
  0x11   :  { %v25_v0 = vld [vmem:[%s24_s20] sm:$0x1]  ;;  %s35_s23 = scalar_lea.vmem %s507_s1, %s516_s14  ;;  %p225_p5 = scmp.lt.s32.totalorder %s224_s15, 63 }
  0x12   :  { %v26_v1 = vmul.f32 5.656854, %v25_v0  ;;  %v36_v2 = vld [vmem:[%s35_s23] sm:$0x1]  ;;  %s518_s15 = smov (!%p41_p4, %s224_s15), 0  ;;  %p51_p6 = scmp.gt.s32.totalorder %s406_s16, 0 }
  0x13   :  { %v37_v3 = vmul.f32 5.656854, %v36_v2  ;;  %p231_p7 = scmp.lt.s32.totalorder %s406_s16, 63  ;;  %s520_s15 = smov (!%p225_p5, %s518_s15), 63 }
  0x14   :  { %28 = vst.msk [vmem:[#allocation4] sm:$0x1] %vm27_vm0, %v26_v1  ;;  %s522_s16 = smov (!%p51_p6, %s406_s16), 0  ;;  %s45_s26 = scalar_lea.vmem %s507_s1, %s520_s15 }
  0x15   :  { %38 = vst.msk [vmem:[#allocation4 + $0x1] sm:$0x1] %vm27_vm0, %v37_v3  ;;  %p61_p8 = scmp.gt.s32.totalorder %s408_s17, 0  ;;  %v46_v4 = vld [vmem:[%s45_s26] sm:$0x1]  ;;  %s524_s16 = smov (!%p231_p7, %s522_s16), 63 }
  0x16   :  { %v47_v5 = vmul.f32 5.656854, %v46_v4  ;;  %s55_s30 = scalar_lea.vmem %s507_s1, %s524_s16  ;;  %p237_p9 = scmp.lt.s32.totalorder %s408_s17, 63 }
  0x17   :  { %s62_s27 = scalar_select %p61_p8, %s408_s17, 0  ;;  %v56_v6 = vld [vmem:[%s55_s30] sm:$0x1] }
  0x18   :  { %48 = vst.msk [vmem:[#allocation4 + $0x2] sm:$0x1] %vm27_vm0, %v47_v5  ;;  %p71_p10 = scmp.gt.s32.totalorder %s410_s18, 0  ;;  %p243_p11 = scmp.lt.s32.totalorder %s410_s18, 63  ;;  %v57_v7 = vmul.f32 5.656854, %v56_v6 }
  0x19   :  { %s526_s27 = smov (!%p237_p9, %s62_s27), 63  ;;  %s248_s6 = sld [smem:[#allocation3 + $0x6]] }
  0x1a   :  { %s528_s18 = smov (!%p71_p10, %s410_s18), 0  ;;  %58 = vst.msk [vmem:[#allocation4 + $0x3] sm:$0x1] %vm27_vm0, %v57_v7  ;;  %s65_s5 = scalar_lea.vmem %s507_s1, %s526_s27 }
  0x1b   :  { %v66_v8 = vld [vmem:[%s65_s5] sm:$0x1]  ;;  %s530_s18 = smov (!%p243_p11, %s528_s18), 63  ;;  %s254_s7 = sld [smem:[#allocation3 + $0x7]] }
  0x1c   :  { %v67_v9 = vmul.f32 5.656854, %v66_v8  ;;  %s75_s10 = scalar_lea.vmem %s507_s1, %s530_s18  ;;  %s260_s11 = sld [smem:[#allocation3 + $0x8]] }
  0x1d   :  { %v76_v10 = vld [vmem:[%s75_s10] sm:$0x1]  ;;  %s444_s12 = sld [smem:[#allocation3 + $0x9]]  ;;  %s385_s10 = smov [#allocation4]  }
  0x1e   :  { %68 = vst.msk [vmem:[#allocation4 + $0x4] sm:$0x1] %vm27_vm0, %v67_v9  ;;  %v77_v11 = vmul.f32 5.656854, %v76_v10  ;;  %s446_s13 = sld [smem:[#allocation3 + $0xa]] }
  0x1f   :  { %p81_p12 = scmp.gt.s32.totalorder %s248_s6, 0  ;;  %p249_p13 = scmp.lt.s32.totalorder %s248_s6, 63 }
  0x20   :  { %78 = vst.msk [vmem:[#allocation4 + $0x5] sm:$0x1] %vm27_vm0, %v77_v11  ;;  %s449_s14 = sld [smem:[#allocation3 + $0xb]] }
  0x21   :  { %s532_s6 = smov (!%p81_p12, %s248_s6), 0  ;;  %p91_p0 = scmp.gt.s32.totalorder %s254_s7, 0 }
  0x22   :  { %p255_p1 = scmp.lt.s32.totalorder %s254_s7, 63  ;;  %s534_s6 = smov (!%p249_p13, %s532_s6), 63 }
  0x23   :  { %s536_s7 = smov (!%p91_p0, %s254_s7), 0  ;;  %s85_s17 = scalar_lea.vmem %s507_s1, %s534_s6 }
  0x24   :  { %p101_p2 = scmp.gt.s32.totalorder %s260_s11, 0  ;;  %v86_v12 = vld [vmem:[%s85_s17] sm:$0x1]  ;;  %s538_s7 = smov (!%p255_p1, %s536_s7), 63 }
  0x25   :  { %v87_v13 = vmul.f32 5.656854, %v86_v12  ;;  %s95_s20 = scalar_lea.vmem %s507_s1, %s538_s7  ;;  %p261_p3 = scmp.lt.s32.totalorder %s260_s11, 63 }
  0x26   :  { %s102_s18 = scalar_select %p101_p2, %s260_s11, 0  ;;  %v96_v14 = vld [vmem:[%s95_s20] sm:$0x1] }
  0x27   :  { %88 = vst.msk [vmem:[#allocation4 + $0x6] sm:$0x1] %vm27_vm0, %v87_v13  ;;  %p111_p4 = scmp.gt.s32.totalorder %s444_s12, 0  ;;  %p267_p5 = scmp.lt.s32.totalorder %s444_s12, 63  ;;  %v97_v15 = vmul.f32 5.656854, %v96_v14 }
  0x28   :  { %s540_s18 = smov (!%p261_p3, %s102_s18), 63  ;;  %p121_p6 = scmp.gt.s32.totalorder %s446_s13, 0 }
  0x29   :  { %s542_s12 = smov (!%p111_p4, %s444_s12), 0  ;;  %98 = vst.msk [vmem:[#allocation4 + $0x7] sm:$0x1] %vm27_vm0, %v97_v15  ;;  %s105_s23 = scalar_lea.vmem %s507_s1, %s540_s18 }
  0x2a   :  { %v106_v16 = vld [vmem:[%s105_s23] sm:$0x1]  ;;  %s544_s12 = smov (!%p267_p5, %s542_s12), 63  ;;  %p273_p7 = scmp.lt.s32.totalorder %s446_s13, 63 }
  0x2b   :  { %v107_v17 = vmul.f32 5.656854, %v106_v16  ;;  %s122_s24 = scalar_select %p121_p6, %s446_s13, 0 }
  0x2c   :  { %s115_s27 = scalar_lea.vmem %s507_s1, %s544_s12  ;;  %p131_p8 = scmp.gt.s32.totalorder %s449_s14, 0 }
  0x2d   :  { %108 = vst.msk [vmem:[#allocation4 + $0x8] sm:$0x1] %vm27_vm0, %v107_v17  ;;  %v116_v18 = vld [vmem:[%s115_s27] sm:$0x1]  ;;  %p279_p9 = scmp.lt.s32.totalorder %s449_s14, 63  ;;  %s546_s24 = smov (!%p273_p7, %s122_s24), 63 }
  0x2e   :  { %v117_v19 = vmul.f32 5.656854, %v116_v18  ;;  %s548_s14 = smov (!%p131_p8, %s449_s14), 0  ;;  %s125_s30 = scalar_lea.vmem %s507_s1, %s546_s24 }
  0x2f   :  { %s284_s3 = sld [smem:[#allocation3 + $0xc]]  ;;  %v126_v20 = vld [vmem:[%s125_s30] sm:$0x1]  ;;  %s550_s14 = smov (!%p279_p9, %s548_s14), 63 }
  0x30   :  { %118 = vst.msk [vmem:[#allocation4 + $0x9] sm:$0x1] %vm27_vm0, %v117_v19  ;;  %v127_v21 = vmul.f32 5.656854, %v126_v20  ;;  %s290_s4 = sld [smem:[#allocation3 + $0xd]]  ;;  %s135_s7 = scalar_lea.vmem %s507_s1, %s550_s14 }
  0x31   :  { %v136_v22 = vld [vmem:[%s135_s7] sm:$0x1]  ;;  %s296_s8 = sld [smem:[#allocation3 + $0xe]]  ;;  %s484_s11 = sshll.u32 %s385_s10, 4  ;;  %s184_s11 = int_to_ptr.vmem [resolvable:$true] %s484_s11 }
  0x32   :  { %128 = vst.msk [vmem:[#allocation4 + $0xa] sm:$0x1] %vm27_vm0, %v127_v21  ;;  %v137_v23 = vmul.f32 5.656854, %v136_v22  ;;  %s302_s9 = sld [smem:[#allocation3 + $0xf]]  ;;  %s185_s23 = sshll.u32 %s508_s2, 4  ;;  %s186_s23 = int_to_ptr.hbm [resolvable:$true] %s185_s23 }
  0x33   :  { %s386_s27 = smov 128  }
  0x34   :  { %138 = vst.msk [vmem:[#allocation4 + $0xb] sm:$0x1] %vm27_vm0, %v137_v23 }
  0x35   :  { %p141_p10 = scmp.gt.s32.totalorder %s284_s3, 0  ;;  %p285_p11 = scmp.lt.s32.totalorder %s284_s3, 63 }
  0x36   :  { %p151_p12 = scmp.gt.s32.totalorder %s290_s4, 0  ;;  %p291_p13 = scmp.lt.s32.totalorder %s290_s4, 63 }
  0x37   :  { %s552_s3 = smov (!%p141_p10, %s284_s3), 0  ;;  %p161_p0 = scmp.gt.s32.totalorder %s296_s8, 0 }
  0x38   :  { %s554_s3 = smov (!%p285_p11, %s552_s3), 63  ;;  %s556_s4 = smov (!%p151_p12, %s290_s4), 0 }
  0x39   :  { %s145_s14 = scalar_lea.vmem %s507_s1, %s554_s3  ;;  %s558_s4 = smov (!%p291_p13, %s556_s4), 63 }
  0x3a   :  { %v146_v24 = vld [vmem:[%s145_s14] sm:$0x1]  ;;  %s162_s15 = scalar_select %p161_p0, %s296_s8, 0 }
  0x3b   :  { %v147_v25 = vmul.f32 5.656854, %v146_v24  ;;  %s155_s18 = scalar_lea.vmem %s507_s1, %s558_s4  ;;  %p297_p1 = scmp.lt.s32.totalorder %s296_s8, 63 }
  0x3c   :  { %v156_v26 = vld [vmem:[%s155_s18] sm:$0x1]  ;;  %p171_p2 = scmp.gt.s32.totalorder %s302_s9, 0  ;;  %p303_p3 = scmp.lt.s32.totalorder %s302_s9, 63 }
  0x3d   :  { %148 = vst.msk [vmem:[#allocation4 + $0xc] sm:$0x1] %vm27_vm0, %v147_v25  ;;  %v157_v27 = vmul.f32 5.656854, %v156_v26  ;;  %s560_s15 = smov (!%p297_p1, %s162_s15), 63 }
  0x3e   :  { %s562_s9 = smov (!%p171_p2, %s302_s9), 0  ;;  %s165_s20 = scalar_lea.vmem %s507_s1, %s560_s15 }
  0x3f   :  { %158 = vst.msk [vmem:[#allocation4 + $0xd] sm:$0x1] %vm27_vm0, %v157_v27  ;;  %v166_v28 = vld [vmem:[%s165_s20] sm:$0x1]  ;;  %s564_s9 = smov (!%p303_p3, %s562_s9), 63 }
  0x40   :  { %v167_v29 = vmul.f32 5.656854, %v166_v28  ;;  %s175_s26 = scalar_lea.vmem %s507_s1, %s564_s9 }
  0x41   :  { %v176_v30 = vld [vmem:[%s175_s26] sm:$0x1] }
  0x42   :  { %168 = vst.msk [vmem:[#allocation4 + $0xe] sm:$0x1] %vm27_vm0, %v167_v29  ;;  %v177_v31 = vmul.f32 5.656854, %v176_v30 }
  0x44   :  { %178 = vst.msk [vmem:[#allocation4 + $0xf] sm:$0x1] %vm27_vm0, %v177_v31 }
  0x45   :  { %191 = dma.vmem_to_hbm [thread:$0]  %s184_s11, 256, %s186_s23, [#allocation5], %s386_s27, %s386_s27, %s387_s28  }
  0x46   :  { %382 = dma.done.wait [#allocation5], 256  }
  0x47   :  { %383 = vsyncadd [#allocation5], 4294967040 }
  0x48   :  { %196 = vsyncpa [#allocation5], 1 }

</bundles_post_ra>
